<compile_context>
chip_gen: v6e
topology: v6e:2x2x1
jax: 0.10.0
libtpu: 0.0.40
codegen_flags: <defaults>
</compile_context>

<pallas_src>
import functools

import jax
import jax.numpy as jnp
from jax import lax
from jax.experimental import pallas as pl
from jax.experimental.pallas import tpu as pltpu


# ---------------------------------------------------------------------------
# Tile / VMEM sizing helpers
# ---------------------------------------------------------------------------
def _vmem_capacity_bytes():
    try:
        cap = getattr(pltpu.get_tpu_info(), "vmem_capacity_bytes", None)
        if cap:
            return int(cap)
    except Exception:
        pass
    return 64 * 1024 * 1024  # conservative: v7x physical VMEM


def _largest_aligned_divisor(full, align, cap):
    """Largest multiple of `align` that divides `full`, at most `cap`.

    Falls back to `full` (legal: block dim == full array dim) when `full` is
    not a multiple of `align`."""
    if full % align != 0:
        return full
    best = align
    cand = align
    limit = min(full, max(align, cap))
    while cand <= limit:
        if full % cand == 0:
            best = cand
        cand += align
    return best


def _pick_tiles(C, M, itemsize, target_block_bytes):
    # Lane tile: multiple of 128 (lane-dense unmasked stores), ~1K-4K lanes.
    m_blk = _largest_aligned_divisor(M, 128, min(M, 4096))
    # Channel (sublane) tile: multiple of 8, fill the remaining byte budget,
    # and keep >= 2 channel blocks when possible so the "parallel" grid axis
    # has work for both v7x TensorCores.
    if C % 8 == 0:
        row_cap = max(8, target_block_bytes // max(1, itemsize * m_blk))
        if C >= 16:
            row_cap = min(row_cap, C // 2)
        c_blk = _largest_aligned_divisor(C, 8, min(C, row_cap))
    else:
        c_blk = C
    return c_blk, m_blk


# ---------------------------------------------------------------------------
# Phase 1: batch statistics -> per-(channel, component) scale/shift.
#   x_ref     : (1, c_blk, m_blk)  lane-interleaved (re, im)
#   gamma_ref : (c_blk, 1)         re_batch weight (used for both components)
#   beta_ref  : (c_blk, 1)         re_batch bias
#   outputs   : 4 x (c_blk, 1)     resident accumulators; after the final
#                                  grid step they hold
#                                  [scale_re, shift_re, scale_im, shift_im].
# ---------------------------------------------------------------------------
def _stats_kernel(x_ref, gamma_ref, beta_ref,
                  sc_re_ref, sh_re_ref, sc_im_ref, sh_im_ref,
                  *, eps, inv_n):
    bi = pl.program_id(1)
    mi = pl.program_id(2)
    first = jnp.logical_and(bi == 0, mi == 0)
    last = jnp.logical_and(bi == pl.num_programs(1) - 1,
                           mi == pl.num_programs(2) - 1)

    @pl.when(first)
    def _():
        sc_re_ref[...] = jnp.zeros_like(sc_re_ref)
        sh_re_ref[...] = jnp.zeros_like(sh_re_ref)
        sc_im_ref[...] = jnp.zeros_like(sc_im_ref)
        sh_im_ref[...] = jnp.zeros_like(sh_im_ref)

    x = x_ref[0].astype(jnp.float32)                       # (c_blk, m_blk)
    xx = x * x
    lane = lax.broadcasted_iota(jnp.int32, x.shape, 1)
    # m_blk is even, so tile-local lane parity equals global parity.
    is_re = jnp.bitwise_and(lane, 1) == 0
    zero = jnp.zeros_like(x)

    s_all = jnp.sum(x, axis=-1, keepdims=True)             # (c_blk, 1)
    q_all = jnp.sum(xx, axis=-1, keepdims=True)
    s_re = jnp.sum(jnp.where(is_re, x, zero), axis=-1, keepdims=True)
    q_re = jnp.sum(jnp.where(is_re, xx, zero), axis=-1, keepdims=True)

    sc_re_ref[...] += s_re            # holds sum(re)   during accumulation
    sh_re_ref[...] += q_re            # holds sum(re^2)
    sc_im_ref[...] += s_all - s_re    # holds sum(im)
    sh_im_ref[...] += q_all - q_re    # holds sum(im^2)

    @pl.when(last)
    def _():
        gamma = gamma_ref[...]                             # (c_blk, 1)
        beta = beta_ref[...]
        s_re_t, q_re_t = sc_re_ref[...], sh_re_ref[...]
        s_im_t, q_im_t = sc_im_ref[...], sh_im_ref[...]

        mean_re = s_re_t * inv_n
        var_re = jnp.maximum(q_re_t * inv_n - mean_re * mean_re, 0.0)
        scl_re = gamma * lax.rsqrt(var_re + eps)
        mean_im = s_im_t * inv_n
        var_im = jnp.maximum(q_im_t * inv_n - mean_im * mean_im, 0.0)
        scl_im = gamma * lax.rsqrt(var_im + eps)

        sc_re_ref[...] = scl_re
        sh_re_ref[...] = beta - mean_re * scl_re
        sc_im_ref[...] = scl_im
        sh_im_ref[...] = beta - mean_im * scl_im


# ---------------------------------------------------------------------------
# Phase 2: elementwise normalize  out = x * scale + shift  (per lane parity).
# ---------------------------------------------------------------------------
def _normalize_kernel(x_ref, sc_re_ref, sh_re_ref, sc_im_ref, sh_im_ref, o_ref):
    x = x_ref[0].astype(jnp.float32)                       # (c_blk, m_blk)
    lane = lax.broadcasted_iota(jnp.int32, x.shape, 1)
    is_re = jnp.bitwise_and(lane, 1) == 0
    scale = jnp.where(is_re, sc_re_ref[...], sc_im_ref[...])   # (c_blk, m_blk)
    shift = jnp.where(is_re, sh_re_ref[...], sh_im_ref[...])
    o_ref[0] = (x * scale + shift).astype(o_ref.dtype)


# ---------------------------------------------------------------------------
# Wrapper
# ---------------------------------------------------------------------------
@functools.partial(jax.jit, static_argnames=("eps",))
def cbatchnorm_forward(x, gamma_re, beta_re, *, eps=1e-5):
    """Complex batch-norm forward (training-mode batch statistics).

    x        : (B, C, H, W, 2)
    gamma_re : (C,)   re_batch weight (applied to both components)
    beta_re  : (C,)   re_batch bias   (applied to both components)
    returns  : (B, C, H, W, 2), same dtype as x
    """
    B, C, H, W, two = x.shape
    assert two == 2
    M = H * W * 2                      # lane axis; even lanes = re, odd = im
    n_per = B * H * W                  # elements per channel per component
    itemsize = jnp.dtype(x.dtype).itemsize

    x3 = x.reshape(B, C, M)            # free view: no HBM transpose
    gamma2 = gamma_re.reshape(C, 1).astype(jnp.float32)
    beta2 = beta_re.reshape(C, 1).astype(jnp.float32)

    cap = _vmem_capacity_bytes()
    target_block_bytes = max(512 << 10, min(4 << 20, cap // 24))
    c_blk, m_blk = _pick_tiles(C, M, itemsize, target_block_bytes)
    block_bytes = c_blk * m_blk * max(itemsize, 4)
    vmem_limit = int(min(max(6 * block_bytes + (2 << 20), 24 << 20), cap // 2))

    grid = (C // c_blk, B, M // m_blk)

    x_spec = pl.BlockSpec((1, c_blk, m_blk), lambda cb, bi, mi: (bi, cb, mi))
    stat_spec = pl.BlockSpec((c_blk, 1), lambda cb, bi, mi: (cb, 0))
    stat_shape = jax.ShapeDtypeStruct((C, 1), jnp.float32)

    # --- phase 1: per-(channel, component) scale/shift from batch stats -----
    scale_re, shift_re, scale_im, shift_im = pl.pallas_call(
        functools.partial(_stats_kernel, eps=float(eps),
                          inv_n=1.0 / float(n_per)),
        out_shape=(stat_shape,) * 4,
        grid_spec=pltpu.PrefetchScalarGridSpec(
            num_scalar_prefetch=0,
            grid=grid,
            in_specs=[x_spec, stat_spec, stat_spec],
            out_specs=[stat_spec] * 4,
        ),
        compiler_params=pltpu.CompilerParams(
            dimension_semantics=("parallel", "arbitrary", "arbitrary"),
            vmem_limit_bytes=vmem_limit),
    )(x3, gamma2, beta2)

    # --- phase 2: elementwise normalize (lane-parity re/im select) ----------
    out3 = pl.pallas_call(
        _normalize_kernel,
        out_shape=jax.ShapeDtypeStruct((B, C, M), x.dtype),
        grid_spec=pltpu.PrefetchScalarGridSpec(
            num_scalar_prefetch=0,
            grid=grid,
            in_specs=[x_spec, stat_spec, stat_spec, stat_spec, stat_spec],
            out_specs=x_spec,
        ),
        compiler_params=pltpu.CompilerParams(
            dimension_semantics=("parallel", "parallel", "parallel"),
            vmem_limit_bytes=vmem_limit),
    )(x3, scale_re, shift_re, scale_im, shift_im)

    return out3.reshape(B, C, H, W, 2)   # free view back: no HBM transpose


# ---------------------------------------------------------------------------
# Pure-JAX reference (PyTorch BatchNorm2d, training mode = batch statistics).
# ---------------------------------------------------------------------------
def _batchnorm2d_ref(x, gamma, beta, eps):
    mean = jnp.mean(x, axis=(0, 2, 3), keepdims=True)
    var = jnp.mean((x - mean) ** 2, axis=(0, 2, 3), keepdims=True)
    xn = (x - mean) / jnp.sqrt(var + eps)
    return xn * gamma[None, :, None, None] + beta[None, :, None, None]


def _cbatchnorm_ref(x, gamma_re, beta_re, eps=1e-5):
    out_re = _batchnorm2d_ref(x[..., 0], gamma_re, beta_re, eps)
    # The module applies re_batch to the imaginary component as well.
    out_im = _batchnorm2d_ref(x[..., 1], gamma_re, beta_re, eps)
    return jnp.stack([out_re, out_im], -1)


# ---------------------------------------------------------------------------
if __name__ == "__main__":
    B, C, H, W = 2, 4, 16, 16

    key = jax.random.PRNGKey(0)
    kx, kg, kb = jax.random.split(key, 3)

    x = jax.random.normal(kx, (B, C, H, W, 2), dtype=jnp.float32)
    # re_batch affine parameters (randomized so the affine path is exercised).
    gamma_re = 1.0 + 0.1 * jax.random.normal(kg, (C,), dtype=jnp.float32)
    beta_re = 0.1 * jax.random.normal(kb, (C,), dtype=jnp.float32)
    # im_batch parameters exist in the module but are unused by its forward.

    out = cbatchnorm_forward(x, gamma_re, beta_re)
    jax.block_until_ready(out)

    out_ref = _cbatchnorm_ref(x, gamma_re, beta_re)
    assert out.shape == (B, C, H, W, 2)
    err = float(jnp.max(jnp.abs(out - out_ref)))
    assert jnp.allclose(out, out_ref, atol=1e-4, rtol=1e-4), err

    print("KERNEL_OK")
</pallas_src>

<mosaic_0001>
module attributes {stable_mosaic.version = 11 : i64} {
  func.func @_stats_kernel(%arg0: i32, %arg1: i32, %arg2: i32, %arg3: memref<1x4x512xf32, #tpu.memory_space<vmem>>, %arg4: memref<4x1xf32, #tpu.memory_space<vmem>>, %arg5: memref<4x1xf32, #tpu.memory_space<vmem>>, %arg6: memref<4x1xf32, #tpu.memory_space<vmem>>, %arg7: memref<4x1xf32, #tpu.memory_space<vmem>>, %arg8: memref<4x1xf32, #tpu.memory_space<vmem>>, %arg9: memref<4x1xf32, #tpu.memory_space<vmem>>) attributes {dimension_semantics = [#tpu.dimension_semantics<parallel>, #tpu.dimension_semantics<arbitrary>, #tpu.dimension_semantics<arbitrary>], iteration_bounds = array<i64: 1, 2, 1>, scalar_prefetch = 0 : i64, scratch_operands = 0 : i64, tpu.core_type = #tpu.core_type<tc>, window_params = [{transform_indices = @transform_0, window_bounds = array<i64: 1, 4, 512>}, {transform_indices = @transform_1, window_bounds = array<i64: 4, 1>}, {transform_indices = @transform_2, window_bounds = array<i64: 4, 1>}, {transform_indices = @transform_3, window_bounds = array<i64: 4, 1>}, {transform_indices = @transform_4, window_bounds = array<i64: 4, 1>}, {transform_indices = @transform_5, window_bounds = array<i64: 4, 1>}, {transform_indices = @transform_6, window_bounds = array<i64: 4, 1>}]} {
    %c0_i32 = arith.constant 0 : i32
    %0 = arith.cmpi eq, %arg1, %c0_i32 : i32
    %c0_i32_0 = arith.constant 0 : i32
    %1 = arith.cmpi eq, %arg2, %c0_i32_0 : i32
    %2 = arith.andi %0, %1 : i1
    %c1_i32 = arith.constant 1 : i32
    %3 = arith.cmpi eq, %arg1, %c1_i32 : i32
    %c0_i32_1 = arith.constant 0 : i32
    %4 = arith.cmpi eq, %arg2, %c0_i32_1 : i32
    %5 = arith.andi %3, %4 : i1
    %6 = arith.extui %2 : i1 to i32
    %c0_i32_2 = arith.constant 0 : i32
    %7 = arith.cmpi ne, %6, %c0_i32_2 : i32
    scf.if %7 {
      %cst_28 = arith.constant 0.000000e+00 : f32
      %43 = vector.broadcast %cst_28 : f32 to vector<4x1xf32>
      %c0_29 = arith.constant 0 : index
      %c0_30 = arith.constant 0 : index
      %44 = vector.load %arg6[%c0_29, %c0_30] : memref<4x1xf32, #tpu.memory_space<vmem>>, vector<4x1xf32>
      tpu.vector_store %arg6[%c0_29, %c0_30], %43 {strides = array<i32>} : memref<4x1xf32, #tpu.memory_space<vmem>>, vector<4x1xf32>,
      %cst_31 = arith.constant 0.000000e+00 : f32
      %45 = vector.broadcast %cst_31 : f32 to vector<4x1xf32>
      %c0_32 = arith.constant 0 : index
      %c0_33 = arith.constant 0 : index
      %46 = vector.load %arg7[%c0_32, %c0_33] : memref<4x1xf32, #tpu.memory_space<vmem>>, vector<4x1xf32>
      tpu.vector_store %arg7[%c0_32, %c0_33], %45 {strides = array<i32>} : memref<4x1xf32, #tpu.memory_space<vmem>>, vector<4x1xf32>,
      %cst_34 = arith.constant 0.000000e+00 : f32
      %47 = vector.broadcast %cst_34 : f32 to vector<4x1xf32>
      %c0_35 = arith.constant 0 : index
      %c0_36 = arith.constant 0 : index
      %48 = vector.load %arg8[%c0_35, %c0_36] : memref<4x1xf32, #tpu.memory_space<vmem>>, vector<4x1xf32>
      tpu.vector_store %arg8[%c0_35, %c0_36], %47 {strides = array<i32>} : memref<4x1xf32, #tpu.memory_space<vmem>>, vector<4x1xf32>,
      %cst_37 = arith.constant 0.000000e+00 : f32
      %49 = vector.broadcast %cst_37 : f32 to vector<4x1xf32>
      %c0_38 = arith.constant 0 : index
      %c0_39 = arith.constant 0 : index
      %50 = vector.load %arg9[%c0_38, %c0_39] : memref<4x1xf32, #tpu.memory_space<vmem>>, vector<4x1xf32>
      tpu.vector_store %arg9[%c0_38, %c0_39], %49 {strides = array<i32>} : memref<4x1xf32, #tpu.memory_space<vmem>>, vector<4x1xf32>,
    } else {
    }
    %c0 = arith.constant 0 : index
    %c0_3 = arith.constant 0 : index
    %c0_4 = arith.constant 0 : index
    %8 = vector.load %arg3[%c0, %c0_3, %c0_4] : memref<1x4x512xf32, #tpu.memory_space<vmem>>, vector<1x4x512xf32>
    %9 = vector.shape_cast %8 : vector<1x4x512xf32> to vector<4x512xf32>
    %10 = arith.mulf %9, %9 : vector<4x512xf32>
    %11 = tpu.iota {dimensions = array<i32: 1>} : vector<4x512xi32>
    %c1_i32_5 = arith.constant 1 : i32
    %12 = vector.broadcast %c1_i32_5 : i32 to vector<4x512xi32>
    %13 = arith.andi %11, %12 : vector<4x512xi32>
    %c0_i32_6 = arith.constant 0 : i32
    %14 = vector.broadcast %c0_i32_6 : i32 to vector<4x512xi32>
    %15 = arith.cmpi eq, %13, %14 : vector<4x512xi32>
    %cst = arith.constant 0.000000e+00 : f32
    %16 = vector.broadcast %cst : f32 to vector<4x512xf32>
    %cst_7 = arith.constant dense<0.000000e+00> : vector<4xf32>
    %17 = vector.multi_reduction <add>, %9, %cst_7 [1] : vector<4x512xf32> to vector<4xf32>
    %18 = vector.shape_cast %17 : vector<4xf32> to vector<4x1xf32>
    %cst_8 = arith.constant dense<0.000000e+00> : vector<4xf32>
    %19 = vector.multi_reduction <add>, %10, %cst_8 [1] : vector<4x512xf32> to vector<4xf32>
    %20 = vector.shape_cast %19 : vector<4xf32> to vector<4x1xf32>
    %21 = arith.select %15, %9, %16 : vector<4x512xi1>, vector<4x512xf32>
    %cst_9 = arith.constant dense<0.000000e+00> : vector<4xf32>
    %22 = vector.multi_reduction <add>, %21, %cst_9 [1] : vector<4x512xf32> to vector<4xf32>
    %23 = vector.shape_cast %22 : vector<4xf32> to vector<4x1xf32>
    %24 = arith.select %15, %10, %16 : vector<4x512xi1>, vector<4x512xf32>
    %cst_10 = arith.constant dense<0.000000e+00> : vector<4xf32>
    %25 = vector.multi_reduction <add>, %24, %cst_10 [1] : vector<4x512xf32> to vector<4xf32>
    %26 = vector.shape_cast %25 : vector<4xf32> to vector<4x1xf32>
    %c0_11 = arith.constant 0 : index
    %c0_12 = arith.constant 0 : index
    %27 = vector.load %arg6[%c0_11, %c0_12] : memref<4x1xf32, #tpu.memory_space<vmem>>, vector<4x1xf32>
    %28 = arith.addf %27, %23 : vector<4x1xf32>
    %c0_13 = arith.constant 0 : index
    %c0_14 = arith.constant 0 : index
    %29 = vector.load %arg6[%c0_13, %c0_14] : memref<4x1xf32, #tpu.memory_space<vmem>>, vector<4x1xf32>
    tpu.vector_store %arg6[%c0_13, %c0_14], %28 {strides = array<i32>} : memref<4x1xf32, #tpu.memory_space<vmem>>, vector<4x1xf32>,
    %c0_15 = arith.constant 0 : index
    %c0_16 = arith.constant 0 : index
    %30 = vector.load %arg7[%c0_15, %c0_16] : memref<4x1xf32, #tpu.memory_space<vmem>>, vector<4x1xf32>
    %31 = arith.addf %30, %26 : vector<4x1xf32>
    %c0_17 = arith.constant 0 : index
    %c0_18 = arith.constant 0 : index
    %32 = vector.load %arg7[%c0_17, %c0_18] : memref<4x1xf32, #tpu.memory_space<vmem>>, vector<4x1xf32>
    tpu.vector_store %arg7[%c0_17, %c0_18], %31 {strides = array<i32>} : memref<4x1xf32, #tpu.memory_space<vmem>>, vector<4x1xf32>,
    %c0_19 = arith.constant 0 : index
    %c0_20 = arith.constant 0 : index
    %33 = vector.load %arg8[%c0_19, %c0_20] : memref<4x1xf32, #tpu.memory_space<vmem>>, vector<4x1xf32>
    %34 = arith.subf %18, %23 : vector<4x1xf32>
    %35 = arith.addf %33, %34 : vector<4x1xf32>
    %c0_21 = arith.constant 0 : index
    %c0_22 = arith.constant 0 : index
    %36 = vector.load %arg8[%c0_21, %c0_22] : memref<4x1xf32, #tpu.memory_space<vmem>>, vector<4x1xf32>
    tpu.vector_store %arg8[%c0_21, %c0_22], %35 {strides = array<i32>} : memref<4x1xf32, #tpu.memory_space<vmem>>, vector<4x1xf32>,
    %c0_23 = arith.constant 0 : index
    %c0_24 = arith.constant 0 : index
    %37 = vector.load %arg9[%c0_23, %c0_24] : memref<4x1xf32, #tpu.memory_space<vmem>>, vector<4x1xf32>
    %38 = arith.subf %20, %26 : vector<4x1xf32>
    %39 = arith.addf %37, %38 : vector<4x1xf32>
    %c0_25 = arith.constant 0 : index
    %c0_26 = arith.constant 0 : index
    %40 = vector.load %arg9[%c0_25, %c0_26] : memref<4x1xf32, #tpu.memory_space<vmem>>, vector<4x1xf32>
    tpu.vector_store %arg9[%c0_25, %c0_26], %39 {strides = array<i32>} : memref<4x1xf32, #tpu.memory_space<vmem>>, vector<4x1xf32>,
    %41 = arith.extui %5 : i1 to i32
    %c0_i32_27 = arith.constant 0 : i32
    %42 = arith.cmpi ne, %41, %c0_i32_27 : i32
    scf.if %42 {
      %c0_28 = arith.constant 0 : index
      %c0_29 = arith.constant 0 : index
      %43 = vector.load %arg4[%c0_28, %c0_29] : memref<4x1xf32, #tpu.memory_space<vmem>>, vector<4x1xf32>
      %c0_30 = arith.constant 0 : index
      %c0_31 = arith.constant 0 : index
      %44 = vector.load %arg5[%c0_30, %c0_31] : memref<4x1xf32, #tpu.memory_space<vmem>>, vector<4x1xf32>
      %c0_32 = arith.constant 0 : index
      %c0_33 = arith.constant 0 : index
      %45 = vector.load %arg6[%c0_32, %c0_33] : memref<4x1xf32, #tpu.memory_space<vmem>>, vector<4x1xf32>
      %c0_34 = arith.constant 0 : index
      %c0_35 = arith.constant 0 : index
      %46 = vector.load %arg7[%c0_34, %c0_35] : memref<4x1xf32, #tpu.memory_space<vmem>>, vector<4x1xf32>
      %c0_36 = arith.constant 0 : index
      %c0_37 = arith.constant 0 : index
      %47 = vector.load %arg8[%c0_36, %c0_37] : memref<4x1xf32, #tpu.memory_space<vmem>>, vector<4x1xf32>
      %c0_38 = arith.constant 0 : index
      %c0_39 = arith.constant 0 : index
      %48 = vector.load %arg9[%c0_38, %c0_39] : memref<4x1xf32, #tpu.memory_space<vmem>>, vector<4x1xf32>
      %cst_40 = arith.constant 0.001953125 : f32
      %49 = vector.broadcast %cst_40 : f32 to vector<4x1xf32>
      %50 = arith.mulf %45, %49 : vector<4x1xf32>
      %cst_41 = arith.constant 0.001953125 : f32
      %51 = vector.broadcast %cst_41 : f32 to vector<4x1xf32>
      %52 = arith.mulf %46, %51 : vector<4x1xf32>
      %53 = arith.mulf %50, %50 : vector<4x1xf32>
      %54 = arith.subf %52, %53 : vector<4x1xf32>
      %cst_42 = arith.constant 0.000000e+00 : f32
      %55 = vector.broadcast %cst_42 : f32 to vector<4x1xf32>
      %56 = arith.maximumf %54, %55 : vector<4x1xf32>
      %cst_43 = arith.constant 9.99999974E-6 : f32
      %57 = vector.broadcast %cst_43 : f32 to vector<4x1xf32>
      %58 = arith.addf %56, %57 : vector<4x1xf32>
      %59 = math.rsqrt %58 : vector<4x1xf32>
      %60 = arith.mulf %43, %59 : vector<4x1xf32>
      %cst_44 = arith.constant 0.001953125 : f32
      %61 = vector.broadcast %cst_44 : f32 to vector<4x1xf32>
      %62 = arith.mulf %47, %61 : vector<4x1xf32>
      %cst_45 = arith.constant 0.001953125 : f32
      %63 = vector.broadcast %cst_45 : f32 to vector<4x1xf32>
      %64 = arith.mulf %48, %63 : vector<4x1xf32>
      %65 = arith.mulf %62, %62 : vector<4x1xf32>
      %66 = arith.subf %64, %65 : vector<4x1xf32>
      %cst_46 = arith.constant 0.000000e+00 : f32
      %67 = vector.broadcast %cst_46 : f32 to vector<4x1xf32>
      %68 = arith.maximumf %66, %67 : vector<4x1xf32>
      %cst_47 = arith.constant 9.99999974E-6 : f32
      %69 = vector.broadcast %cst_47 : f32 to vector<4x1xf32>
      %70 = arith.addf %68, %69 : vector<4x1xf32>
      %71 = math.rsqrt %70 : vector<4x1xf32>
      %72 = arith.mulf %43, %71 : vector<4x1xf32>
      %c0_48 = arith.constant 0 : index
      %c0_49 = arith.constant 0 : index
      %73 = vector.load %arg6[%c0_48, %c0_49] : memref<4x1xf32, #tpu.memory_space<vmem>>, vector<4x1xf32>
      tpu.vector_store %arg6[%c0_48, %c0_49], %60 {strides = array<i32>} : memref<4x1xf32, #tpu.memory_space<vmem>>, vector<4x1xf32>,
      %74 = arith.mulf %50, %60 : vector<4x1xf32>
      %75 = arith.subf %44, %74 : vector<4x1xf32>
      %c0_50 = arith.constant 0 : index
      %c0_51 = arith.constant 0 : index
      %76 = vector.load %arg7[%c0_50, %c0_51] : memref<4x1xf32, #tpu.memory_space<vmem>>, vector<4x1xf32>
      tpu.vector_store %arg7[%c0_50, %c0_51], %75 {strides = array<i32>} : memref<4x1xf32, #tpu.memory_space<vmem>>, vector<4x1xf32>,
      %c0_52 = arith.constant 0 : index
      %c0_53 = arith.constant 0 : index
      %77 = vector.load %arg8[%c0_52, %c0_53] : memref<4x1xf32, #tpu.memory_space<vmem>>, vector<4x1xf32>
      tpu.vector_store %arg8[%c0_52, %c0_53], %72 {strides = array<i32>} : memref<4x1xf32, #tpu.memory_space<vmem>>, vector<4x1xf32>,
      %78 = arith.mulf %62, %72 : vector<4x1xf32>
      %79 = arith.subf %44, %78 : vector<4x1xf32>
      %c0_54 = arith.constant 0 : index
      %c0_55 = arith.constant 0 : index
      %80 = vector.load %arg9[%c0_54, %c0_55] : memref<4x1xf32, #tpu.memory_space<vmem>>, vector<4x1xf32>
      tpu.vector_store %arg9[%c0_54, %c0_55], %79 {strides = array<i32>} : memref<4x1xf32, #tpu.memory_space<vmem>>, vector<4x1xf32>,
    } else {
    }
    return
  }
  func.func @transform_0(%arg0: i32, %arg1: i32, %arg2: i32) -> (i32, i32, i32) {
    %c0_i32 = arith.constant 0 : i32
    return %arg1, %arg0, %arg2 : i32, i32, i32
  }
  func.func @transform_1(%arg0: i32, %arg1: i32, %arg2: i32) -> (i32, i32) {
    %c0_i32 = arith.constant 0 : i32
    %c0_i32_0 = arith.constant 0 : i32
    return %arg0, %c0_i32 : i32, i32
  }
  func.func @transform_2(%arg0: i32, %arg1: i32, %arg2: i32) -> (i32, i32) {
    %c0_i32 = arith.constant 0 : i32
    %c0_i32_0 = arith.constant 0 : i32
    return %arg0, %c0_i32 : i32, i32
  }
  func.func @transform_3(%arg0: i32, %arg1: i32, %arg2: i32) -> (i32, i32) {
    %c0_i32 = arith.constant 0 : i32
    %c0_i32_0 = arith.constant 0 : i32
    return %arg0, %c0_i32 : i32, i32
  }
  func.func @transform_4(%arg0: i32, %arg1: i32, %arg2: i32) -> (i32, i32) {
    %c0_i32 = arith.constant 0 : i32
    %c0_i32_0 = arith.constant 0 : i32
    return %arg0, %c0_i32 : i32, i32
  }
  func.func @transform_5(%arg0: i32, %arg1: i32, %arg2: i32) -> (i32, i32) {
    %c0_i32 = arith.constant 0 : i32
    %c0_i32_0 = arith.constant 0 : i32
    return %arg0, %c0_i32 : i32, i32
  }
  func.func @transform_6(%arg0: i32, %arg1: i32, %arg2: i32) -> (i32, i32) {
    %c0_i32 = arith.constant 0 : i32
    %c0_i32_0 = arith.constant 0 : i32
    return %arg0, %c0_i32 : i32, i32
  }
}

module attributes {stable_mosaic.version = 11 : i64} {
  func.func @_normalize_kernel(%arg0: i32, %arg1: i32, %arg2: i32, %arg3: memref<1x4x512xf32, #tpu.memory_space<vmem>>, %arg4: memref<4x1xf32, #tpu.memory_space<vmem>>, %arg5: memref<4x1xf32, #tpu.memory_space<vmem>>, %arg6: memref<4x1xf32, #tpu.memory_space<vmem>>, %arg7: memref<4x1xf32, #tpu.memory_space<vmem>>, %arg8: memref<1x4x512xf32, #tpu.memory_space<vmem>>) attributes {dimension_semantics = [#tpu.dimension_semantics<parallel>, #tpu.dimension_semantics<parallel>, #tpu.dimension_semantics<parallel>], iteration_bounds = array<i64: 1, 2, 1>, scalar_prefetch = 0 : i64, scratch_operands = 0 : i64, tpu.core_type = #tpu.core_type<tc>, window_params = [{transform_indices = @transform_0, window_bounds = array<i64: 1, 4, 512>}, {transform_indices = @transform_1, window_bounds = array<i64: 4, 1>}, {transform_indices = @transform_2, window_bounds = array<i64: 4, 1>}, {transform_indices = @transform_3, window_bounds = array<i64: 4, 1>}, {transform_indices = @transform_4, window_bounds = array<i64: 4, 1>}, {transform_indices = @transform_5, window_bounds = array<i64: 1, 4, 512>}]} {
    %c0 = arith.constant 0 : index
    %c0_0 = arith.constant 0 : index
    %c0_1 = arith.constant 0 : index
    %0 = vector.load %arg3[%c0, %c0_0, %c0_1] : memref<1x4x512xf32, #tpu.memory_space<vmem>>, vector<1x4x512xf32>
    %1 = vector.shape_cast %0 : vector<1x4x512xf32> to vector<4x512xf32>
    %2 = tpu.iota {dimensions = array<i32: 1>} : vector<4x512xi32>
    %c1_i32 = arith.constant 1 : i32
    %3 = vector.broadcast %c1_i32 : i32 to vector<4x512xi32>
    %4 = arith.andi %2, %3 : vector<4x512xi32>
    %c0_i32 = arith.constant 0 : i32
    %5 = vector.broadcast %c0_i32 : i32 to vector<4x512xi32>
    %6 = arith.cmpi eq, %4, %5 : vector<4x512xi32>
    %c0_2 = arith.constant 0 : index
    %c0_3 = arith.constant 0 : index
    %7 = vector.load %arg4[%c0_2, %c0_3] : memref<4x1xf32, #tpu.memory_space<vmem>>, vector<4x1xf32>
    %c0_4 = arith.constant 0 : index
    %c0_5 = arith.constant 0 : index
    %8 = vector.load %arg6[%c0_4, %c0_5] : memref<4x1xf32, #tpu.memory_space<vmem>>, vector<4x1xf32>
    %9 = vector.shape_cast %7 : vector<4x1xf32> to vector<4x1xf32>
    %10 = vector.broadcast %9 : vector<4x1xf32> to vector<4x512xf32>
    %11 = vector.shape_cast %8 : vector<4x1xf32> to vector<4x1xf32>
    %12 = vector.broadcast %11 : vector<4x1xf32> to vector<4x512xf32>
    %13 = arith.select %6, %10, %12 : vector<4x512xi1>, vector<4x512xf32>
    %c0_6 = arith.constant 0 : index
    %c0_7 = arith.constant 0 : index
    %14 = vector.load %arg5[%c0_6, %c0_7] : memref<4x1xf32, #tpu.memory_space<vmem>>, vector<4x1xf32>
    %c0_8 = arith.constant 0 : index
    %c0_9 = arith.constant 0 : index
    %15 = vector.load %arg7[%c0_8, %c0_9] : memref<4x1xf32, #tpu.memory_space<vmem>>, vector<4x1xf32>
    %16 = vector.shape_cast %14 : vector<4x1xf32> to vector<4x1xf32>
    %17 = vector.broadcast %16 : vector<4x1xf32> to vector<4x512xf32>
    %18 = vector.shape_cast %15 : vector<4x1xf32> to vector<4x1xf32>
    %19 = vector.broadcast %18 : vector<4x1xf32> to vector<4x512xf32>
    %20 = arith.select %6, %17, %19 : vector<4x512xi1>, vector<4x512xf32>
    %21 = arith.mulf %1, %13 : vector<4x512xf32>
    %22 = arith.addf %21, %20 : vector<4x512xf32>
    %c0_10 = arith.constant 0 : index
    %c0_11 = arith.constant 0 : index
    %c0_12 = arith.constant 0 : index
    %23 = vector.load %arg8[%c0_10, %c0_11, %c0_12] : memref<1x4x512xf32, #tpu.memory_space<vmem>>, vector<1x4x512xf32>
    %24 = vector.shape_cast %23 : vector<1x4x512xf32> to vector<4x512xf32>
    %25 = vector.shape_cast %22 : vector<4x512xf32> to vector<1x4x512xf32>
    tpu.vector_store %arg8[%c0_10, %c0_11, %c0_12], %25 {strides = array<i32>} : memref<1x4x512xf32, #tpu.memory_space<vmem>>, vector<1x4x512xf32>,
    return
  }
  func.func @transform_0(%arg0: i32, %arg1: i32, %arg2: i32) -> (i32, i32, i32) {
    %c0_i32 = arith.constant 0 : i32
    return %arg1, %arg0, %arg2 : i32, i32, i32
  }
  func.func @transform_1(%arg0: i32, %arg1: i32, %arg2: i32) -> (i32, i32) {
    %c0_i32 = arith.constant 0 : i32
    %c0_i32_0 = arith.constant 0 : i32
    return %arg0, %c0_i32 : i32, i32
  }
  func.func @transform_2(%arg0: i32, %arg1: i32, %arg2: i32) -> (i32, i32) {
    %c0_i32 = arith.constant 0 : i32
    %c0_i32_0 = arith.constant 0 : i32
    return %arg0, %c0_i32 : i32, i32
  }
  func.func @transform_3(%arg0: i32, %arg1: i32, %arg2: i32) -> (i32, i32) {
    %c0_i32 = arith.constant 0 : i32
    %c0_i32_0 = arith.constant 0 : i32
    return %arg0, %c0_i32 : i32, i32
  }
  func.func @transform_4(%arg0: i32, %arg1: i32, %arg2: i32) -> (i32, i32) {
    %c0_i32 = arith.constant 0 : i32
    %c0_i32_0 = arith.constant 0 : i32
    return %arg0, %c0_i32 : i32, i32
  }
  func.func @transform_5(%arg0: i32, %arg1: i32, %arg2: i32) -> (i32, i32, i32) {
    %c0_i32 = arith.constant 0 : i32
    return %arg1, %arg0, %arg2 : i32, i32, i32
  }
}

</mosaic_0001>

<bundles_post_ra>
// kernel: cbatchnorm_forward.3
= control target key start
LH: loop header
LB: loop body
LE: loop exit
PB: predicated region body
PF: predicated region fallthrough
CT: control target
= control target key end

     0   :  { %s703_s18 = smov 0   ;;  %s705_s19 = smov 0   ;;  %s783_s0 = inlined_call_operand.vmem [shape: f32[2,4,512], index: 0, kind: input, shape index: {}]   ;;  %s784_s1 = inlined_call_operand.vmem [shape: f32[4,1], index: 1, kind: input, shape index: {}]   ;;  %s785_s2 = inlined_call_operand.vmem [shape: f32[4,1], index: 2, kind: input, shape index: {}]   ;;  %s786_s3 = inlined_call_operand.vmem [shape: f32[4,1], index: 3, kind: input, shape index: {}]   ;;  %s787_s4 = inlined_call_operand.vmem [shape: f32[4,1], index: 4, kind: input, shape index: {}]   ;;  %s788_s5 = inlined_call_operand.vmem [shape: f32[2,4,512], index: 5, kind: output, shape index: {}]  }
   0x1   :  { %s707_s20 = smov 0  }
   0x2 LB: > { %s30_s21 = sadd.s32 1, %s666_s19  ;;  %p612_p0 = scmp.ge.s32.totalorder %s670_s20, 1  ;;  %s670_s20 = sphi %s707_s20, %s15_s20   ;;  %s666_s19 = sphi %s705_s19, %s798_s19   ;;  %s662_s18 = sphi %s703_s18, %s797_s18  }
   0x3   : > { %p32_p1 = scmp.ge.s32.totalorder %s30_s21, 2  ;;  %p259_p2 = scmp.lt.s32.totalorder %s670_s20, 3 }
   0x5   : > { %s800_s21 = smov (%p32_p1, %s30_s21), 0  ;;  %p260_p3 = pnand %p612_p0, %p259_p2 }
   0x6   : > { %p320_p4 = scmp.lt.s32.totalorder (!%p260_p3), %s662_s18, 1 }
   0x7   : > { %263 = sbr.rel (%p260_p3) target bundleno = 151 (0x97), region = 40 }
   0xc   : > { %v394_v0 = vld [vmem:[%s785_s2] sm:$0xf]  ;;  %v672_v2 = vmov 0   ;;  %v365_v5 = vlaneseq  ;;  %s802_s18 = smov (!%p320_p4, %s662_s18), 1 }
   0xd   : > { %v378_v1 = vld [vmem:[%s784_s1] sm:$0xf]  ;;  %647 = vset.pattern.permute.xlu1 %v672_v2  ;;  %646 = vset.pattern.permute.xlu0 %v672_v2  ;;  %s619_s30 = sshll.u32 %s802_s18, 4 }
   0xe   : > { %398 = vperm.xlu1 %647, %v394_v0   ;;  %382 = vperm.xlu0 %646, %v378_v1   ;;  %v395_v3 = vld [vmem:[%s787_s4] sm:$0xf]  ;;  %v366_v6 = vand.u32 127, %v365_v5  ;;  %s331_s8 = scalar_lea.vmem %s783_s0, %s619_s30  ;;  %s361_s11 = scalar_lea.vmem %s788_s5, %s619_s30 }
   0xf   : > { %v379_v4 = vld [vmem:[%s786_s3] sm:$0xf]  ;;  %v364_v29 = vld [vmem:[%s331_s8 + $0x8] sm:$0xff] }
  0x10   : > { %v367_v7 = vadd.s32 128, %v366_v6  ;;  %v368_v8 = vadd.s32 256, %v366_v6  ;;  %v369_v9 = vadd.s32 384, %v366_v6  ;;  %v370_v10 = vand.u32 1, %v366_v6  ;;  %v363_v25 = vld [vmem:[%s331_s8] sm:$0xff] }
  0x12   : > { %403 = vperm.xlu1 %647, %v395_v3   ;;  %387 = vperm.xlu0 %646, %v379_v4   ;;  %v371_v11 = vand.u32 1, %v367_v7  ;;  %v372_v12 = vand.u32 1, %v368_v8  ;;  %v373_v15 = vand.u32 1, %v369_v9  ;;  %vm736_vm0 = vcmp.eq.s32.totalorder %v370_v10, 0 }
  0x14   : > { %vm740_vm1 = vcmp.eq.s32.totalorder %v371_v11, 0  ;;  %vm744_vm2 = vcmp.eq.s32.totalorder %v372_v12, 0  ;;  %vm751_vm3 = vcmp.eq.s32.totalorder %v373_v15, 0 }
  0x89   : > { %v399_v13 = vpop.permute.xlu1 %398  ;;  %v383_v14 = vpop.permute.xlu0 %382 }
  0x8d   : > { %v404_v19 = vpop.permute.xlu1 %403  ;;  %v388_v21 = vpop.permute.xlu0 %387 }
  0x8e   : > { %v406_v22 = vsel %vm736_vm0, %v399_v13, %v404_v19  ;;  %v407_v23 = vsel %vm740_vm1, %v399_v13, %v404_v19  ;;  %v408_v24 = vsel %vm744_vm2, %v399_v13, %v404_v19  ;;  %v390_v26 = vsel %vm736_vm0, %v383_v14, %v388_v21 }
  0x8f   : > { %v391_v27 = vsel %vm740_vm1, %v383_v14, %v388_v21  ;;  %v409_v28 = vsel %vm751_vm3, %v399_v13, %v404_v19  ;;  %v392_v30 = vsel %vm744_vm2, %v383_v14, %v388_v21  ;;  %v393_v31 = vsel %vm751_vm3, %v383_v14, %v388_v21 }
  0x90   : > { %v414_v32 = vcombine.low %v390_v26, %v391_v27  ;;  %v415_v33 = vcombine.low %v392_v30, %v393_v31  ;;  %v424_v34 = vcombine.low %v406_v22, %v407_v23  ;;  %v425_v36 = vcombine.low %v408_v24, %v409_v28 }
  0x92   : > { %v418_v35 = vmul.f32 %v414_v32, %v363_v25  ;;  %v419_v37 = vmul.f32 %v415_v33, %v364_v29 }
  0x94   : > { %v428_v38 = vadd.f32 %v424_v34, %v418_v35  ;;  %v429_v39 = vadd.f32 %v425_v36, %v419_v37 }
  0x96   : > { %430 = vst [vmem:[%s361_s11] sm:$0xff] %v428_v38  ;;  %431 = vst [vmem:[%s361_s11 + $0x8] sm:$0xff] %v429_v39 }
  0x97 PF: > { %s15_s20 = sadd.s32 1, %s670_s20   ;;  %s797_s18 = smov %s666_s19 }
  0x98   : > { %p12_p5 = scmp.ge.s32.totalorder %s15_s20, 4   ;;  %s798_s19 = smov %s800_s21 }
  0x9a   :  { %14 = sbr.rel (!%p12_p5) target bundleno = 2 (0x2), region = 82 }

// kernel: cbatchnorm_forward.2
= control target key start
LH: loop header
LB: loop body
LE: loop exit
PB: predicated region body
PF: predicated region fallthrough
CT: control target
= control target key end

     0   :  { %s797_s21 = smov 0   ;;  %s799_s22 = smov 0   ;;  %s957_s0 = inlined_call_operand.vmem [shape: f32[2,4,512], index: 0, kind: input, shape index: {}]   ;;  %s958_s1 = inlined_call_operand.vmem [shape: f32[4,1], index: 1, kind: input, shape index: {}]   ;;  %s959_s2 = inlined_call_operand.vmem [shape: f32[4,1], index: 2, kind: input, shape index: {}]   ;;  %s960_s3 = inlined_call_operand.vmem [shape: f32[4,1], index: 3, kind: output, shape index: {0}]   ;;  %s961_s4 = inlined_call_operand.vmem [shape: f32[4,1], index: 4, kind: output, shape index: {1}]   ;;  %s962_s5 = inlined_call_operand.vmem [shape: f32[4,1], index: 5, kind: output, shape index: {2}]   ;;  %s963_s6 = inlined_call_operand.vmem [shape: f32[4,1], index: 6, kind: output, shape index: {3}]  }
   0x1   :  { %s801_s23 = smov 0  }
   0x2 LB: > { %s32_s24 = sadd.s32 1, %s755_s22  ;;  %p692_p0 = scmp.ge.s32.totalorder %s759_s23, 1  ;;  %s759_s23 = sphi %s801_s23, %s17_s23   ;;  %s755_s22 = sphi %s799_s22, %s973_s22   ;;  %s751_s21 = sphi %s797_s21, %s972_s21  }
   0x3   : > { %p34_p1 = scmp.ge.s32.totalorder %s32_s24, 2  ;;  %p269_p2 = scmp.lt.s32.totalorder %s759_s23, 3 }
   0x5   : > { %s975_s24 = smov (%p34_p1, %s32_s24), 0  ;;  %p270_p3 = pnand %p692_p0, %p269_p2 }
   0x6   : > { %p327_p4 = scmp.lt.s32.totalorder (!%p270_p3), %s751_s21, 1  ;;  %p364_p5 = scmp.eq.s32.totalorder (!%p270_p3), %s751_s21, 0 }
   0x7   : > { %273 = sbr.rel (%p270_p3) target bundleno = 218 (0xda), region = 32  ;;  %p368_p6 = scmp.eq.s32.totalorder (!%p270_p3), %s751_s21, 1 }
   0xc   : > { %s328_s25 = scalar_select %p327_p4, %s751_s21, 1  ;;  %vm373_vm0 = vcmask (%p364_p5), 3072   ;;  %v761_v0 = vmov (%p364_p5), 0.0  }
   0xd   : > { %372 = sbr.rel (!%p364_p5) target bundleno = 18 (0x12), region = 36  ;;  %374 = vst.msk [vmem:[%s960_s3] sm:$0xf] (%p364_p5), %vm373_vm0, %v761_v0  ;;  %375 = vst.msk [vmem:[%s961_s4] sm:$0xf] (%p364_p5), %vm373_vm0, %v761_v0 }
   0xe   : > { %s703_s26 = sshll.u32 %s328_s25, 4  ;;  %376 = vst.msk [vmem:[%s962_s5] sm:$0xf] (%p364_p5), %vm373_vm0, %v761_v0  ;;  %377 = vst.msk [vmem:[%s963_s6] sm:$0xf] (%p364_p5), %vm373_vm0, %v761_v0 }
   0xf   : > { %s338_s29 = scalar_lea.vmem %s957_s0, %s703_s26 }
  0x12 PF: > { %v378_v1 = vld [vmem:[%s338_s29] sm:$0xff]  ;;  %v379_v2 = vld [vmem:[%s338_s29 + $0x8] sm:$0xff]  ;;  %v382_v3 = vlaneseq  ;;  %vm401_vm1 = vcmask 1043456   ;;  %vm454_vm6 = vcmask 3072  }
  0x13   : > { %v397_v4 = vcombine.high %v378_v1, %v378_v1  ;;  %v398_v5 = vcombine.high %v379_v2, %v379_v2  ;;  %v402_v7 = vsel %vm401_vm1, %v378_v1, 0.0  ;;  %v380_v8 = vmul.f32 %v378_v1, %v378_v1  ;;  %v469_v24 = vld [vmem:[%s958_s1] sm:$0xf] (%p368_p6) }
  0x14   : > { %v383_v6 = vand.u32 127, %v382_v3  ;;  %v381_v9 = vmul.f32 %v379_v2, %v379_v2  ;;  %v405_v11 = vsel %vm401_vm1, %v379_v2, 0.0  ;;  %v452_v59 = vld [vmem:[%s960_s3] sm:$0xf] }
  0x15   : > { %v403_v10 = vsel %vm401_vm1, %v397_v4, 0.0  ;;  %v407_v12 = vsel %vm401_vm1, %v398_v5, 0.0  ;;  %v413_v18 = vcombine.high %v380_v8, %v380_v8  ;;  %v417_v20 = vsel %vm401_vm1, %v380_v8, 0.0  ;;  %v459_v61 = vld [vmem:[%s962_s5] sm:$0xf] }
  0x16   : > { %v384_v13 = vadd.s32 128, %v383_v6  ;;  %v385_v14 = vadd.s32 256, %v383_v6  ;;  %v386_v15 = vadd.s32 384, %v383_v6  ;;  %v387_v16 = vand.u32 1, %v383_v6  ;;  %v456_v0 = vld [vmem:[%s961_s4] sm:$0xf] }
  0x17   : > { %v404_v17 = vadd.f32 %v403_v10, %v402_v7  ;;  %v414_v19 = vcombine.high %v381_v9, %v381_v9  ;;  %v418_v28 = vsel %vm401_vm1, %v413_v18, 0.0  ;;  %v420_v50 = vsel %vm401_vm1, %v381_v9, 0.0 }
  0x18   : > { %v388_v21 = vand.u32 1, %v384_v13  ;;  %v389_v22 = vand.u32 1, %v385_v14  ;;  %v390_v23 = vand.u32 1, %v386_v15  ;;  %vm841_vm2 = vcmp.eq.s32.totalorder %v387_v16, 0 }
  0x19   : > { %v426_v25 = vsel %vm841_vm2, %v378_v1, 0.0  ;;  %v406_v26 = vadd.f32 %v405_v11, %v404_v17  ;;  %v439_v27 = vsel %vm841_vm2, %v380_v8, 0.0  ;;  %v419_v47 = vadd.f32 %v418_v28, %v417_v20  ;;  %v470_v28 = vld [vmem:[%s959_s2] sm:$0xf] (%p368_p6) }
  0x1a   : > { %vm850_vm3 = vcmp.eq.s32.totalorder %v388_v21, 0  ;;  %vm854_vm4 = vcmp.eq.s32.totalorder %v389_v22, 0  ;;  %vm858_vm5 = vcmp.eq.s32.totalorder %v390_v23, 0  ;;  %v430_v32 = vsel %vm401_vm1, %v426_v25, 0.0 }
  0x1b   : > { %v427_v33 = vsel %vm850_vm3, %v397_v4, 0.0  ;;  %v428_v34 = vsel %vm854_vm4, %v379_v2, 0.0  ;;  %v429_v35 = vsel %vm858_vm5, %v398_v5, 0.0  ;;  %v408_v36 = vadd.f32 %v407_v12, %v406_v26  ;;  %v463_v4 = vld [vmem:[%s963_s6] sm:$0xf] }
  0x1c   : > { %v431_v37 = vsel %vm401_vm1, %v427_v33, 0.0  ;;  %v433_v38 = vsel %vm401_vm1, %v428_v34, 0.0  ;;  %v440_v39 = vsel %vm850_vm3, %v413_v18, 0.0  ;;  %v441_v41 = vsel %vm854_vm4, %v381_v9, 0.0 }
  0x1d   : > { %v432_v40 = vadd.f32 %v431_v37, %v430_v32  ;;  %409 = vadd.xlane.f32.xlu0 %v408_v36  ;;  %v442_v42 = vsel %vm858_vm5, %v414_v19, 0.0  ;;  %v443_v43 = vsel %vm401_vm1, %v439_v27, 0.0  ;;  %v435_v44 = vsel %vm401_vm1, %v429_v35, 0.0 }
  0x1e   : > { %v444_v45 = vsel %vm401_vm1, %v440_v39, 0.0  ;;  %v446_v46 = vsel %vm401_vm1, %v441_v41, 0.0  ;;  %v422_v51 = vsel %vm401_vm1, %v414_v19, 0.0  ;;  %v448_v52 = vsel %vm401_vm1, %v442_v42, 0.0 }
  0x1f   : > { %v434_v48 = vadd.f32 %v433_v38, %v432_v40  ;;  %v445_v49 = vadd.f32 %v444_v45, %v443_v43  ;;  %v421_v53 = vadd.f32 %v420_v50, %v419_v47 }
  0x21   : > { %v436_v54 = vadd.f32 %v435_v44, %v434_v48  ;;  %v447_v55 = vadd.f32 %v446_v46, %v445_v49  ;;  %v423_v56 = vadd.f32 %v422_v51, %v421_v53 }
  0x23   : > { %437 = vadd.xlane.f32.xlu1 %v436_v54  ;;  %v449_v57 = vadd.f32 %v448_v52, %v447_v55  ;;  %424 = vadd.xlane.f32.xlu0 %v423_v56 }
  0x27   : > { %450 = vadd.xlane.f32.xlu1 %v449_v57 }
  0xa6   : > { %v410_v58 = vpop.xlane.xlu0 %409 }
  0xac   : > { %v438_v60 = vpop.xlane.xlu1 %437  ;;  %v425_v1 = vpop.xlane.xlu0 %424 }
  0xad   : > { %v453_v62 = vadd.f32 %v452_v59, %v438_v60  ;;  %v460_v63 = vsub.f32 %v410_v58, %v438_v60 }
  0xaf   : > { %455 = vst.msk [vmem:[%s960_s3] sm:$0xf] %vm454_vm6, %v453_v62  ;;  %v461_v2 = vadd.f32 %v460_v63, %v459_v61 }
  0xb0   : > { %v451_v3 = vpop.xlane.xlu1 %450 }
  0xb1   : > { %462 = vst.msk [vmem:[%s962_s5] sm:$0xf] %vm454_vm6, %v461_v2  ;;  %v457_v5 = vadd.f32 %v456_v0, %v451_v3  ;;  %v464_v6 = vsub.f32 %v425_v1, %v451_v3  ;;  %468 = sbr.rel (!%p368_p6) target bundleno = 218 (0xda), region = 40 }
  0xb3   : > { %458 = vst.msk [vmem:[%s961_s4] sm:$0xf] %vm454_vm6, %v457_v5  ;;  %v465_v7 = vadd.f32 %v464_v6, %v463_v4 }
  0xb5   : > { %466 = vst.msk [vmem:[%s963_s6] sm:$0xf] %vm454_vm6, %v465_v7 }
  0xb6   : > { %v471_v8 = vld [vmem:[%s960_s3] sm:$0xf] }
  0xb7   : > { %v475_v10 = vmul.f32 0.001953125, %v471_v8 }
  0xb8   : > { %v473_v12 = vld [vmem:[%s962_s5] sm:$0xf] }
  0xb9   : > { %v483_v14 = vmul.f32 0.001953125, %v473_v12  ;;  %v477_v15 = vmul.f32 %v475_v10, %v475_v10 }
  0xba   : > { %v472_v9 = vld [vmem:[%s961_s4] sm:$0xf] }
  0xbb   : > { %v476_v11 = vmul.f32 0.001953125, %v472_v9  ;;  %v485_v17 = vmul.f32 %v483_v14, %v483_v14 }
  0xbc   : > { %v474_v13 = vld [vmem:[%s963_s6] sm:$0xf] }
  0xbd   : > { %v484_v16 = vmul.f32 0.001953125, %v474_v13  ;;  %v478_v18 = vsub.f32 %v476_v11, %v477_v15 }
  0xbf   : > { %v486_v19 = vsub.f32 %v484_v16, %v485_v17  ;;  %v479_v20 = vmax.f32 %v478_v18, 0.0 }
  0xc1   : > { %v487_v21 = vmax.f32 %v486_v19, 0.0  ;;  %v480_v22 = vadd.f32 1e-05, %v479_v20 }
  0xc3   : > { %v488_v23 = vadd.f32 1e-05, %v487_v21  ;;  %733 = vrsqrt.f32 %v480_v22 }
  0xc5   : > { %735 = vrsqrt.f32 %v488_v23 }
  0xd0   : > { %v734_v25 = vpop.eup %733 }
  0xd1   : > { %v482_v27 = vmul.f32 %v734_v25, %v469_v24 }
  0xd2   : > { %v736_v26 = vpop.eup %735 }
  0xd3   : > { %v490_v29 = vmul.f32 %v736_v26, %v469_v24  ;;  %491 = vst.msk [vmem:[%s960_s3] sm:$0xf] %vm454_vm6, %v482_v27  ;;  %v492_v30 = vmul.f32 %v482_v27, %v475_v10 }
  0xd5   : > { %495 = vst.msk [vmem:[%s962_s5] sm:$0xf] %vm454_vm6, %v490_v29  ;;  %v496_v31 = vmul.f32 %v490_v29, %v483_v14  ;;  %v493_v32 = vsub.f32 %v470_v28, %v492_v30 }
  0xd7   : > { %v497_v33 = vsub.f32 %v470_v28, %v496_v31  ;;  %494 = vst.msk [vmem:[%s961_s4] sm:$0xf] %vm454_vm6, %v493_v32 }
  0xd9   : > { %498 = vst.msk [vmem:[%s963_s6] sm:$0xf] %vm454_vm6, %v497_v33 }
  0xda PF: > { %s17_s23 = sadd.s32 1, %s759_s23   ;;  %s972_s21 = smov %s755_s22 }
  0xdb   : > { %p14_p7 = scmp.ge.s32.totalorder %s17_s23, 4   ;;  %s973_s22 = smov %s975_s24 }
  0xdd   :  { %16 = sbr.rel (!%p14_p7) target bundleno = 2 (0x2), region = 112 }

</bundles_post_ra>
